<compile_context>
chip_gen: v7x
topology: tpu7x:2x2x1
jax: 0.10.0
libtpu: 0.0.40
codegen_flags: <defaults>
</compile_context>

<pallas_src>
import jax
import jax.numpy as jnp
from jax.experimental import pallas as pl
from jax.experimental.pallas import tpu as pltpu


def _transpose_block_kernel(x_ref, o_ref):
    # x_ref: (TB, TS, TD) input tile  ->  o_ref: (TB, TD, TS) output tile.
    o_ref[...] = jnp.swapaxes(x_ref[...], 1, 2)


def _vmem_capacity_bytes():
    # Per-generation VMEM (v5e/v6e: 128 MiB; v7x: 64 MiB per core).  Fall back
    # to the most conservative (v7x) figure if the query is unavailable.
    try:
        cap = int(pltpu.get_tpu_info().vmem_capacity_bytes)
        if cap > 0:
            return cap
    except Exception:
        pass
    return 64 * 2**20


def _axis_tile(dim, itemsize, cap_elems=2048):
    """Block length along one of the two transposed axes.

    * dim <= 128: single full-dim block (satisfies the (8,128)-or-full rule).
    * dim  > 128: largest multiple of 128 <= min(dim, cap_elems); trailing
      ragged blocks are handled by the cdiv grid.
    """
    if dim <= 128:
        return dim
    t = (min(dim, cap_elems) // 128) * 128
    # Keep contiguous DMA rows >= 512B for narrow dtypes when the dim allows.
    floor = 256 if (itemsize < 4 and dim >= 256) else 128
    return max(t, floor)


def _choose_tiles(B, S, D, itemsize, tile_budget_bytes):
    ts = _axis_tile(S, itemsize)
    td = _axis_tile(D, itemsize)
    floor_s = S if S <= 128 else (256 if (itemsize < 4 and S >= 256) else 128)
    floor_d = D if D <= 128 else (256 if (itemsize < 4 and D >= 256) else 128)
    # Shrink the larger tiled axis until the tile fits the per-tile budget.
    while ts * td * itemsize > tile_budget_bytes:
        if ts >= td and ts > floor_s:
            ts = max(floor_s, ((ts // 2) // 128) * 128)
        elif td > floor_d:
            td = max(floor_d, ((td // 2) // 128) * 128)
        else:
            break
    # Fold batch elements into the block while the budget allows (amortizes
    # per-step overhead and grows each DMA for small-S/D PatchTST shapes).
    # Only divisors of B are used so the batch grid axis is never ragged.
    tb_cap = max(1, min(B, tile_budget_bytes // max(1, ts * td * itemsize)))
    tb = 1
    for t in range(1, tb_cap + 1):
        if B % t == 0:
            tb = t
    return tb, ts, td


def pallas_transpose(x, dim0=1, dim1=2):
    """torch.Tensor.transpose(dim0, dim1)[.contiguous()] for 3-D (B, S, D)
    inputs with {dim0, dim1} == {1, 2} (the PatchTST / TimeXer usage)."""
    nd = x.ndim
    d0, d1 = dim0 % nd, dim1 % nd
    if nd != 3 or {d0, d1} != {1, 2}:
        # General fallback for other axis swaps (not the PatchTST hot path).
        return jnp.swapaxes(x, d0, d1)

    B, S, D = x.shape
    if B == 0 or S == 0 or D == 0:
        return jnp.swapaxes(x, 1, 2)

    itemsize = jnp.dtype(x.dtype).itemsize
    vmem_cap = _vmem_capacity_bytes()
    # ~4 live tile buffers (double-buffered in + out) must stay well under the
    # per-core VMEM: budget ~ cap/10 -> ~6.4 MiB/tile on v7x, ~12.8 on v5e/v6e.
    tile_budget = vmem_cap // 10

    TB, TS, TD = _choose_tiles(B, S, D, itemsize, tile_budget)
    grid = (B // TB, pl.cdiv(D, TD), pl.cdiv(S, TS))

    tile_bytes = TB * TS * TD * itemsize
    vmem_limit = int(min(vmem_cap, max(6 * tile_bytes, 8 * 2**20)))

    return pl.pallas_call(
        _transpose_block_kernel,
        out_shape=jax.ShapeDtypeStruct((B, D, S), x.dtype),
        grid_spec=pltpu.PrefetchScalarGridSpec(
            num_scalar_prefetch=0,
            grid=grid,
            # Innermost grid axis walks S-tiles (i): consecutive steps write
            # consecutive column-blocks within the same output row-span.
            in_specs=[pl.BlockSpec((TB, TS, TD), lambda b, j, i: (b, i, j))],
            out_specs=pl.BlockSpec((TB, TD, TS), lambda b, j, i: (b, j, i)),
        ),
        compiler_params=pltpu.CompilerParams(
            dimension_semantics=("parallel", "parallel", "parallel"),
            vmem_limit_bytes=vmem_limit,
        ),
        cost_estimate=pl.CostEstimate(
            flops=0,
            transcendentals=0,
            bytes_accessed=2 * B * S * D * itemsize,
        ),
    )(x)


class TransposePallas:
    """Mirror of the PyTorch `Transpose` module (no parameters)."""

    def __init__(self, *dims, contiguous=False):
        self.dims = dims
        self.contiguous = contiguous  # Pallas output is always materialized

    def __call__(self, x):
        return pallas_transpose(x, *self.dims)


if __name__ == "__main__":
    key = jax.random.PRNGKey(0)
    module = TransposePallas(1, 2, contiguous=True)

    # 1) Small PatchTST-like shape (full-dim blocks, batch folded into block).
    B, S, D = 2, 8, 32
    x = jax.random.normal(key, (B, S, D), dtype=jnp.float32)
    y = jax.block_until_ready(module(x))
    ref = jnp.transpose(x, (0, 2, 1))
    assert y.shape == (B, D, S), y.shape
    assert jnp.allclose(y, ref), "mismatch vs reference transpose (small shape)"

    # 2) 128-aligned shape exercising the tiled path.
    B2, S2, D2 = 2, 384, 256
    x2 = jax.random.normal(jax.random.PRNGKey(1), (B2, S2, D2), dtype=jnp.float32)
    y2 = jax.block_until_ready(module(x2))
    ref2 = jnp.transpose(x2, (0, 2, 1))
    assert y2.shape == (B2, D2, S2), y2.shape
    assert jnp.allclose(y2, ref2), "mismatch vs reference transpose (tiled shape)"

    # 3) Non-128-multiple dims exercising the cdiv / ragged-edge path
    #    (OOB input padding must only land in masked OOB output regions).
    B3, S3, D3 = 2, 136, 160
    x3 = jax.random.normal(jax.random.PRNGKey(2), (B3, S3, D3), dtype=jnp.float32)
    y3 = jax.block_until_ready(module(x3))
    ref3 = jnp.transpose(x3, (0, 2, 1))
    assert y3.shape == (B3, D3, S3), y3.shape
    assert jnp.allclose(y3, ref3), "mismatch vs reference transpose (ragged shape)"

    print("KERNEL_OK")
</pallas_src>

<mosaic_0001>
module attributes {stable_mosaic.version = 11 : i64} {
  func.func @_transpose_block_kernel(%arg0: i32, %arg1: i32, %arg2: i32, %arg3: memref<2x8x32xf32, #tpu.memory_space<vmem>>, %arg4: memref<2x32x8xf32, #tpu.memory_space<vmem>>) attributes {dimension_semantics = [#tpu.dimension_semantics<parallel>, #tpu.dimension_semantics<parallel>, #tpu.dimension_semantics<parallel>], iteration_bounds = array<i64: 1, 1, 1>, scalar_prefetch = 0 : i64, scratch_operands = 0 : i64, tpu.core_type = #tpu.core_type<tc>, window_params = [{transform_indices = @transform_0, window_bounds = array<i64: 2, 8, 32>}, {transform_indices = @transform_1, window_bounds = array<i64: 2, 32, 8>}]} {
    %c0 = arith.constant 0 : index
    %c0_0 = arith.constant 0 : index
    %c0_1 = arith.constant 0 : index
    %0 = vector.load %arg3[%c0, %c0_0, %c0_1] : memref<2x8x32xf32, #tpu.memory_space<vmem>>, vector<2x8x32xf32>
    %1 = tpu.transpose %0, [0, 2, 1] : vector<2x8x32xf32> -> vector<2x32x8xf32>
    %c0_2 = arith.constant 0 : index
    %c0_3 = arith.constant 0 : index
    %c0_4 = arith.constant 0 : index
    %2 = vector.load %arg4[%c0_2, %c0_3, %c0_4] : memref<2x32x8xf32, #tpu.memory_space<vmem>>, vector<2x32x8xf32>
    tpu.vector_store %arg4[%c0_2, %c0_3, %c0_4], %1 {strides = array<i32>} : memref<2x32x8xf32, #tpu.memory_space<vmem>>, vector<2x32x8xf32>,
    return
  }
  func.func @transform_0(%arg0: i32, %arg1: i32, %arg2: i32) -> (i32, i32, i32) {
    %c0_i32 = arith.constant 0 : i32
    return %arg0, %arg2, %arg1 : i32, i32, i32
  }
  func.func @transform_1(%arg0: i32, %arg1: i32, %arg2: i32) -> (i32, i32, i32) {
    %c0_i32 = arith.constant 0 : i32
    return %arg0, %arg1, %arg2 : i32, i32, i32
  }
}

</mosaic_0001>

<bundles_post_ra>
// kernel: tpu_custom_call.1
= control target key start
LH: loop header
LB: loop body
LE: loop exit
PB: predicated region body
PF: predicated region fallthrough
CT: control target
= control target key end

     0   :  { %6 = vsyncpa [#allocation3], 0  ;;  %s130_s6 = smov [#allocation2]   ;;  %s187_s0 = inlined_call_operand.hbm [shape: f32[2,8,32], index: 0, kind: input, shape index: {}]   ;;  %s188_s1 = inlined_call_operand.vmem [shape: f32[2,32,8], index: 1, kind: output, shape index: {}]  }
   0x1   :  { %s12_s7 = sshll.u32 %s130_s6, 4  ;;  %s106_s10 = scalar_lea.hbm %s187_s0, 256  ;;  %s13_s7 = int_to_ptr.vmem [resolvable:$true] %s12_s7 }
   0x2   :  { %p107_p0 = scmp.ne.s32.totalorder %s187_s0, %s106_s10  ;;  %p110_p1 = scmp.lt.u32.totalorder %s106_s10, %s187_s0 }
   0x4   :  { %p112_p2 = pnand %p110_p1, %p107_p0 }
   0x6   :  { %115 = shalt.err (!%p112_p2)
}
   0x7   :  { %s116_s15 = scalar_lea.vmem %s13_s7, 256  ;;  %p121_p4 = scmp.lt.s32.totalorder %s13_s7, %s13_s7 }
   0x8   :  { %p117_p3 = scmp.ne.s32.totalorder %s13_s7, %s116_s15  ;;  %p122_p5 = scmp.lt.s32.totalorder %s116_s15, %s116_s15 }
   0xa   :  { %p123_p6 = por %p122_p5, %p121_p4 }
   0xc   :  { %p124_p7 = pnand %p123_p6, %p117_p3 }
   0xe   :  { %127 = shalt.err (!%p124_p7)
}
   0xf   :  { %s131_s16 = smov 128   ;;  %s132_s17 = smov 8  }
  0x10   :  { %18 = dma.hbm_to_vmem [thread:$0]  %s187_s0, 256, %s13_s7, [#allocation3], %s131_s16, %s131_s16, %s132_s17  }
  0x11   :  { %128 = dma.done.wait [#allocation3], 256  }
  0x12   :  { %129 = vsyncadd [#allocation3], 4294967040  ;;  %v22_v0 = vld [vmem:[#allocation2] sm:$0xff]  ;;  %v23_v1 = vld [vmem:[#allocation2 + $0x8] sm:$0xff]  ;;  %vm88_vm0 = vcmask 64512  }
  0x13   :  { %24 = vxpose.xlu0.b32.start.end [1/1] (short) (narrow) %v22_v0, 32 }
  0x20   :  { %56 = vxpose.xlu0.b32.start.end [1/1] (short) (narrow) %v23_v1, 32 }
  0x93   :  { %v40_v2 = vpop.trf.xlu0 }
  0x94   :  { %89 = vst.msk [vmem:[%s188_s1] sm:$0xff] %vm88_vm0, %v40_v2 }
  0x97   :  { %v41_v3 = vpop.trf.xlu0 }
  0x98   :  { %90 = vst.msk [vmem:[%s188_s1 + $0x8] sm:$0xff] %vm88_vm0, %v41_v3 }
  0x9b   :  { %v42_v4 = vpop.trf.xlu0 }
  0x9c   :  { %91 = vst.msk [vmem:[%s188_s1 + $0x10] sm:$0xff] %vm88_vm0, %v42_v4 }
  0x9f   :  { %v43_v5 = vpop.trf.xlu0 }
  0xa0   :  { %92 = vst.msk [vmem:[%s188_s1 + $0x18] sm:$0xff] %vm88_vm0, %v43_v5 }
  0xa3   :  { %v72_v6 = vpop.trf.xlu0 }
  0xa4   :  { %93 = vst.msk [vmem:[%s188_s1 + $0x20] sm:$0xff] %vm88_vm0, %v72_v6 }
  0xa7   :  { %v73_v7 = vpop.trf.xlu0 }
  0xa8   :  { %94 = vst.msk [vmem:[%s188_s1 + $0x28] sm:$0xff] %vm88_vm0, %v73_v7 }
  0xab   :  { %v74_v8 = vpop.trf.xlu0 }
  0xac   :  { %95 = vst.msk [vmem:[%s188_s1 + $0x30] sm:$0xff] %vm88_vm0, %v74_v8 }
  0xaf   :  { %v75_v9 = vpop.trf.xlu0 }
  0xb0   :  { %96 = vst.msk [vmem:[%s188_s1 + $0x38] sm:$0xff] %vm88_vm0, %v75_v9 }
  0xb1   :  { %101 = vsyncpa [#allocation3], 1 }

</bundles_post_ra>
